<compile_context>
chip_gen: v5e
topology: v5e:2x2
jax: 0.10.0
libtpu: 0.0.40
codegen_flags: <defaults>
</compile_context>

<pallas_src>
import functools

import jax
import jax.numpy as jnp
from jax.experimental import pallas as pl
from jax.experimental.pallas import tpu as pltpu


def _round_up(n, m):
    return ((n + m - 1) // m) * m


def _pad_to(a, shape):
    pads = [(0, t - s) for s, t in zip(a.shape, shape)]
    if all(p == (0, 0) for p in pads):
        return a
    return jnp.pad(a, pads)


def _xavier_uniform(key, fan_in, fan_out, dtype=jnp.float32):
    # matches torch.nn.init.xavier_uniform_ with gain=1 (symmetric in fan_in/fan_out,
    # so the [in, out] storage layout does not change the distribution).
    limit = (6.0 / (fan_in + fan_out)) ** 0.5
    return jax.random.uniform(key, (fan_in, fan_out), dtype=dtype, minval=-limit, maxval=limit)


def _predict_net_kernel(x_ref, w1_ref, b1_ref, c1_ref, w2_ref, b2_ref, w3_ref, b3_ref,
                        o_ref, *, hidden_dim, eps):
    w_dtype = w1_ref.dtype

    # linear1 (MXU, f32 accumulation)
    x = x_ref[...].astype(w_dtype)
    h = jnp.dot(x, w1_ref[...], preferred_element_type=jnp.float32) + b1_ref[...]

    # LayerNorm (center=True, scale=False), torch.std semantics: unbiased variance
    # (divide by N-1), eps added to std.  Padded lanes are excluded from the stats.
    hidden_pad = h.shape[-1]
    if hidden_pad != hidden_dim:
        valid = jax.lax.broadcasted_iota(jnp.int32, (1, hidden_pad), 1) < hidden_dim
        h_stat = jnp.where(valid, h, 0.0)
    else:
        valid = None
        h_stat = h
    mean = jnp.sum(h_stat, axis=-1, keepdims=True) * (1.0 / hidden_dim)
    hc = h - mean                                      # centered tensor, reused
    hc_sq = hc * hc if valid is None else jnp.where(valid, hc * hc, 0.0)
    var_unbiased = jnp.sum(hc_sq, axis=-1, keepdims=True) * (1.0 / (hidden_dim - 1))
    inv = pl.reciprocal(jnp.sqrt(var_unbiased) + eps, approx=True)   # EUP slot
    h = hc * inv + c1_ref[...]

    # ReLU
    h = jnp.maximum(h, 0.0)

    # linear2 + ReLU (padded-in rows of w2 are zero -> padded lanes contribute nothing)
    h = jnp.dot(h.astype(w_dtype), w2_ref[...], preferred_element_type=jnp.float32) + b2_ref[...]
    h = jnp.maximum(h, 0.0)

    # last_fc
    o_ref[...] = (jnp.dot(h.astype(w_dtype), w3_ref[...], preferred_element_type=jnp.float32)
                  + b3_ref[...]).astype(o_ref.dtype)


def predict_net_forward(x, params, *, eps=1e-6, block_batch=256):
    """x: [B, num_inputs] float32.  params: dict of weights (see init_params)."""
    B, num_inputs = x.shape
    hidden_dim = params["w1"].shape[1]
    num_outputs = params["w3"].shape[1]

    # Lane-dense padding of feature dims (multiples of 128); padded weight rows/cols and
    # biases are zero, and LayerNorm stats mask padded lanes, so semantics are unchanged.
    hidden_pad = _round_up(hidden_dim, 128)
    out_pad = _round_up(num_outputs, 128)

    w1 = _pad_to(params["w1"], (num_inputs, hidden_pad))
    b1 = _pad_to(params["b1"], (1, hidden_pad))
    c1 = _pad_to(params["c1"], (1, hidden_pad))
    w2 = _pad_to(params["w2"], (hidden_pad, hidden_pad))
    b2 = _pad_to(params["b2"], (1, hidden_pad))
    w3 = _pad_to(params["w3"], (hidden_pad, out_pad))
    b3 = _pad_to(params["b3"], (1, out_pad))

    # Batch tiling: tb rows per grid step (multiple of 8 sublanes); pad B up to a multiple.
    tb = min(block_batch, _round_up(B, 8))
    b_pad = _round_up(B, tb)
    x_p = x if b_pad == B else jnp.pad(x, ((0, b_pad - B), (0, 0)))

    kernel = functools.partial(_predict_net_kernel, hidden_dim=hidden_dim, eps=eps)

    out = pl.pallas_call(
        kernel,
        out_shape=jax.ShapeDtypeStruct((b_pad, out_pad), jnp.float32),
        grid=(b_pad // tb,),
        in_specs=[
            pl.BlockSpec((tb, num_inputs), lambda i: (i, 0)),          # x tile (pipelined)
            pl.BlockSpec((num_inputs, hidden_pad), lambda i: (0, 0)),  # w1 (resident)
            pl.BlockSpec((1, hidden_pad), lambda i: (0, 0)),           # b1
            pl.BlockSpec((1, hidden_pad), lambda i: (0, 0)),           # c1 (LayerNorm center)
            pl.BlockSpec((hidden_pad, hidden_pad), lambda i: (0, 0)),  # w2
            pl.BlockSpec((1, hidden_pad), lambda i: (0, 0)),           # b2
            pl.BlockSpec((hidden_pad, out_pad), lambda i: (0, 0)),     # w3
            pl.BlockSpec((1, out_pad), lambda i: (0, 0)),              # b3
        ],
        out_specs=pl.BlockSpec((tb, out_pad), lambda i: (i, 0)),
        compiler_params=pltpu.CompilerParams(dimension_semantics=("parallel",)),
    )(x_p, w1, b1, c1, w2, b2, w3, b3)

    return out[:B, :num_outputs]


def init_params(key, num_inputs, hidden_dim, num_outputs, weight_dtype=jnp.float32):
    """Weights stored [in, out] (transpose of torch's [out, in]); biases kept in f32."""
    k1, k2, k3 = jax.random.split(key, 3)
    return {
        "w1": _xavier_uniform(k1, num_inputs, hidden_dim).astype(weight_dtype),
        "b1": jnp.zeros((1, hidden_dim), jnp.float32),
        "c1": jnp.zeros((1, hidden_dim), jnp.float32),   # LayerNorm center_param
        "w2": _xavier_uniform(k2, hidden_dim, hidden_dim).astype(weight_dtype),
        "b2": jnp.zeros((1, hidden_dim), jnp.float32),
        "w3": _xavier_uniform(k3, hidden_dim, num_outputs).astype(weight_dtype),
        "b3": jnp.zeros((1, num_outputs), jnp.float32),
    }


def _reference_forward(x, params, eps=1e-6):
    f32 = lambda a: a.astype(jnp.float32)
    h = x @ f32(params["w1"]) + params["b1"]
    mean = h.mean(-1, keepdims=True)
    std = jnp.sqrt(((h - mean) ** 2).sum(-1, keepdims=True) / (h.shape[-1] - 1))
    h = (h - mean) / (std + eps) + params["c1"]
    h = jax.nn.relu(h)
    h = jax.nn.relu(h @ f32(params["w2"]) + params["b2"])
    return h @ f32(params["w3"]) + params["b3"]


# TODO(synk): get_log_p / update (MSE loss + Adam optimizer step) are training utilities,
# not part of the forward pass, and are not implemented as Pallas kernels here.


if __name__ == "__main__":
    num_inputs, hidden_dim, num_outputs = 16, 32, 8
    batch = 8

    key = jax.random.PRNGKey(0)
    kx, kp = jax.random.split(key)
    x = jax.random.normal(kx, (batch, num_inputs), dtype=jnp.float32)

    # f32-weight path
    params = init_params(kp, num_inputs, hidden_dim, num_outputs)
    out = jax.block_until_ready(predict_net_forward(x, params))
    ref = _reference_forward(x, params)
    assert out.shape == (batch, num_outputs)
    assert jnp.allclose(out, ref, atol=1e-2, rtol=1e-2)

    # bf16-weight path (bf16 MXU matmuls with f32 accumulation); looser tolerance.
    params_bf16 = {k: (v.astype(jnp.bfloat16) if k in ("w1", "w2", "w3") else v)
                   for k, v in params.items()}
    out_bf16 = jax.block_until_ready(predict_net_forward(x, params_bf16))
    ref_bf16 = _reference_forward(x, params_bf16)
    assert out_bf16.shape == (batch, num_outputs)
    assert jnp.allclose(out_bf16, ref_bf16, atol=5e-2, rtol=5e-2)

    print("KERNEL_OK")
</pallas_src>

<mosaic_0001>
module attributes {stable_mosaic.version = 11 : i64} {
  func.func @_predict_net_kernel(%arg0: i32, %arg1: memref<8x16xf32, #tpu.memory_space<vmem>>, %arg2: memref<16x128xf32, #tpu.memory_space<vmem>>, %arg3: memref<1x128xf32, #tpu.memory_space<vmem>>, %arg4: memref<1x128xf32, #tpu.memory_space<vmem>>, %arg5: memref<128x128xf32, #tpu.memory_space<vmem>>, %arg6: memref<1x128xf32, #tpu.memory_space<vmem>>, %arg7: memref<128x128xf32, #tpu.memory_space<vmem>>, %arg8: memref<1x128xf32, #tpu.memory_space<vmem>>, %arg9: memref<8x128xf32, #tpu.memory_space<vmem>>) attributes {dimension_semantics = [#tpu.dimension_semantics<parallel>], iteration_bounds = array<i64: 1>, scalar_prefetch = 0 : i64, scratch_operands = 0 : i64, tpu.core_type = #tpu.core_type<tc>, window_params = [{transform_indices = @transform_0, window_bounds = array<i64: 8, 16>}, {pipeline_mode = #tpu.pipeline_mode<synchronous>, transform_indices = @transform_1, window_bounds = array<i64: 16, 128>}, {pipeline_mode = #tpu.pipeline_mode<synchronous>, transform_indices = @transform_2, window_bounds = array<i64: 1, 128>}, {pipeline_mode = #tpu.pipeline_mode<synchronous>, transform_indices = @transform_3, window_bounds = array<i64: 1, 128>}, {pipeline_mode = #tpu.pipeline_mode<synchronous>, transform_indices = @transform_4, window_bounds = array<i64: 128, 128>}, {pipeline_mode = #tpu.pipeline_mode<synchronous>, transform_indices = @transform_5, window_bounds = array<i64: 1, 128>}, {pipeline_mode = #tpu.pipeline_mode<synchronous>, transform_indices = @transform_6, window_bounds = array<i64: 128, 128>}, {pipeline_mode = #tpu.pipeline_mode<synchronous>, transform_indices = @transform_7, window_bounds = array<i64: 1, 128>}, {transform_indices = @transform_8, window_bounds = array<i64: 8, 128>}]} {
    %c0 = arith.constant 0 : index
    %c0_0 = arith.constant 0 : index
    %0 = vector.load %arg1[%c0, %c0_0] : memref<8x16xf32, #tpu.memory_space<vmem>>, vector<8x16xf32>
    %c0_1 = arith.constant 0 : index
    %c0_2 = arith.constant 0 : index
    %1 = vector.load %arg2[%c0_1, %c0_2] : memref<16x128xf32, #tpu.memory_space<vmem>>, vector<16x128xf32>
    %cst = arith.constant dense<0.000000e+00> : vector<8x128xf32>
    %2 = tpu.matmul %0, %1, %cst {dimension_numbers = #tpu.dot_dimension_numbers<[1], [0], [0], [1], [0, 0, 1, 1], [], []>} : vector<8x16xf32>, vector<16x128xf32>, vector<8x128xf32> -> vector<8x128xf32>
    %c0_3 = arith.constant 0 : index
    %c0_4 = arith.constant 0 : index
    %3 = vector.load %arg3[%c0_3, %c0_4] : memref<1x128xf32, #tpu.memory_space<vmem>>, vector<1x128xf32>
    %4 = vector.broadcast %3 : vector<1x128xf32> to vector<8x128xf32>
    %5 = arith.addf %2, %4 : vector<8x128xf32>
    %6 = tpu.iota {dimensions = array<i32: 1>} : vector<1x128xi32>
    %c32_i32 = arith.constant 32 : i32
    %7 = vector.broadcast %c32_i32 : i32 to vector<1x128xi32>
    %8 = arith.cmpi slt, %6, %7 : vector<1x128xi32>
    %cst_5 = arith.constant 0.000000e+00 : f32
    %9 = vector.shape_cast %8 : vector<1x128xi1> to vector<1x128xi1>
    %10 = vector.broadcast %9 : vector<1x128xi1> to vector<8x128xi1>
    %11 = vector.broadcast %cst_5 : f32 to vector<8x128xf32>
    %12 = arith.select %10, %5, %11 : vector<8x128xi1>, vector<8x128xf32>
    %cst_6 = arith.constant dense<0.000000e+00> : vector<8xf32>
    %13 = vector.multi_reduction <add>, %12, %cst_6 [1] : vector<8x128xf32> to vector<8xf32>
    %14 = vector.shape_cast %13 : vector<8xf32> to vector<8x1xf32>
    %cst_7 = arith.constant 3.125000e-02 : f32
    %15 = vector.broadcast %cst_7 : f32 to vector<8x1xf32>
    %16 = arith.mulf %14, %15 : vector<8x1xf32>
    %17 = vector.broadcast %16 : vector<8x1xf32> to vector<8x128xf32>
    %18 = arith.subf %5, %17 : vector<8x128xf32>
    %19 = arith.mulf %18, %18 : vector<8x128xf32>
    %cst_8 = arith.constant 0.000000e+00 : f32
    %20 = vector.shape_cast %8 : vector<1x128xi1> to vector<1x128xi1>
    %21 = vector.broadcast %20 : vector<1x128xi1> to vector<8x128xi1>
    %22 = vector.broadcast %cst_8 : f32 to vector<8x128xf32>
    %23 = arith.select %21, %19, %22 : vector<8x128xi1>, vector<8x128xf32>
    %cst_9 = arith.constant dense<0.000000e+00> : vector<8xf32>
    %24 = vector.multi_reduction <add>, %23, %cst_9 [1] : vector<8x128xf32> to vector<8xf32>
    %25 = vector.shape_cast %24 : vector<8xf32> to vector<8x1xf32>
    %cst_10 = arith.constant 0.0322580636 : f32
    %26 = vector.broadcast %cst_10 : f32 to vector<8x1xf32>
    %27 = arith.mulf %25, %26 : vector<8x1xf32>
    %28 = math.sqrt %27 : vector<8x1xf32>
    %cst_11 = arith.constant 9.99999997E-7 : f32
    %29 = vector.broadcast %cst_11 : f32 to vector<8x1xf32>
    %30 = arith.addf %28, %29 : vector<8x1xf32>
    %31 = tpu.reciprocal %30 {approx = true} : vector<8x1xf32> -> vector<8x1xf32>
    %32 = vector.broadcast %31 : vector<8x1xf32> to vector<8x128xf32>
    %33 = arith.mulf %18, %32 : vector<8x128xf32>
    %c0_12 = arith.constant 0 : index
    %c0_13 = arith.constant 0 : index
    %34 = vector.load %arg4[%c0_12, %c0_13] : memref<1x128xf32, #tpu.memory_space<vmem>>, vector<1x128xf32>
    %35 = vector.broadcast %34 : vector<1x128xf32> to vector<8x128xf32>
    %36 = arith.addf %33, %35 : vector<8x128xf32>
    %cst_14 = arith.constant 0.000000e+00 : f32
    %37 = vector.broadcast %cst_14 : f32 to vector<8x128xf32>
    %38 = arith.maximumf %36, %37 : vector<8x128xf32>
    %c0_15 = arith.constant 0 : index
    %c0_16 = arith.constant 0 : index
    %39 = vector.load %arg5[%c0_15, %c0_16] : memref<128x128xf32, #tpu.memory_space<vmem>>, vector<128x128xf32>
    %cst_17 = arith.constant dense<0.000000e+00> : vector<8x128xf32>
    %40 = tpu.matmul %38, %39, %cst_17 {dimension_numbers = #tpu.dot_dimension_numbers<[1], [0], [0], [1], [0, 0, 1, 1], [], []>} : vector<8x128xf32>, vector<128x128xf32>, vector<8x128xf32> -> vector<8x128xf32>
    %c0_18 = arith.constant 0 : index
    %c0_19 = arith.constant 0 : index
    %41 = vector.load %arg6[%c0_18, %c0_19] : memref<1x128xf32, #tpu.memory_space<vmem>>, vector<1x128xf32>
    %42 = vector.broadcast %41 : vector<1x128xf32> to vector<8x128xf32>
    %43 = arith.addf %40, %42 : vector<8x128xf32>
    %cst_20 = arith.constant 0.000000e+00 : f32
    %44 = vector.broadcast %cst_20 : f32 to vector<8x128xf32>
    %45 = arith.maximumf %43, %44 : vector<8x128xf32>
    %c0_21 = arith.constant 0 : index
    %c0_22 = arith.constant 0 : index
    %46 = vector.load %arg7[%c0_21, %c0_22] : memref<128x128xf32, #tpu.memory_space<vmem>>, vector<128x128xf32>
    %cst_23 = arith.constant dense<0.000000e+00> : vector<8x128xf32>
    %47 = tpu.matmul %45, %46, %cst_23 {dimension_numbers = #tpu.dot_dimension_numbers<[1], [0], [0], [1], [0, 0, 1, 1], [], []>} : vector<8x128xf32>, vector<128x128xf32>, vector<8x128xf32> -> vector<8x128xf32>
    %c0_24 = arith.constant 0 : index
    %c0_25 = arith.constant 0 : index
    %48 = vector.load %arg8[%c0_24, %c0_25] : memref<1x128xf32, #tpu.memory_space<vmem>>, vector<1x128xf32>
    %49 = vector.broadcast %48 : vector<1x128xf32> to vector<8x128xf32>
    %50 = arith.addf %47, %49 : vector<8x128xf32>
    %c0_26 = arith.constant 0 : index
    %c0_27 = arith.constant 0 : index
    %51 = vector.load %arg9[%c0_26, %c0_27] : memref<8x128xf32, #tpu.memory_space<vmem>>, vector<8x128xf32>
    tpu.vector_store %arg9[%c0_26, %c0_27], %50 {strides = array<i32>} : memref<8x128xf32, #tpu.memory_space<vmem>>, vector<8x128xf32>,
    return
  }
  func.func @transform_0(%arg0: i32) -> (i32, i32) {
    %c0_i32 = arith.constant 0 : i32
    %c0_i32_0 = arith.constant 0 : i32
    return %arg0, %c0_i32 : i32, i32
  }
  func.func @transform_1(%arg0: i32) -> (i32, i32) {
    %c0_i32 = arith.constant 0 : i32
    %c0_i32_0 = arith.constant 0 : i32
    %c0_i32_1 = arith.constant 0 : i32
    return %c0_i32, %c0_i32_0 : i32, i32
  }
  func.func @transform_2(%arg0: i32) -> (i32, i32) {
    %c0_i32 = arith.constant 0 : i32
    %c0_i32_0 = arith.constant 0 : i32
    %c0_i32_1 = arith.constant 0 : i32
    return %c0_i32, %c0_i32_0 : i32, i32
  }
  func.func @transform_3(%arg0: i32) -> (i32, i32) {
    %c0_i32 = arith.constant 0 : i32
    %c0_i32_0 = arith.constant 0 : i32
    %c0_i32_1 = arith.constant 0 : i32
    return %c0_i32, %c0_i32_0 : i32, i32
  }
  func.func @transform_4(%arg0: i32) -> (i32, i32) {
    %c0_i32 = arith.constant 0 : i32
    %c0_i32_0 = arith.constant 0 : i32
    %c0_i32_1 = arith.constant 0 : i32
    return %c0_i32, %c0_i32_0 : i32, i32
  }
  func.func @transform_5(%arg0: i32) -> (i32, i32) {
    %c0_i32 = arith.constant 0 : i32
    %c0_i32_0 = arith.constant 0 : i32
    %c0_i32_1 = arith.constant 0 : i32
    return %c0_i32, %c0_i32_0 : i32, i32
  }
  func.func @transform_6(%arg0: i32) -> (i32, i32) {
    %c0_i32 = arith.constant 0 : i32
    %c0_i32_0 = arith.constant 0 : i32
    %c0_i32_1 = arith.constant 0 : i32
    return %c0_i32, %c0_i32_0 : i32, i32
  }
  func.func @transform_7(%arg0: i32) -> (i32, i32) {
    %c0_i32 = arith.constant 0 : i32
    %c0_i32_0 = arith.constant 0 : i32
    %c0_i32_1 = arith.constant 0 : i32
    return %c0_i32, %c0_i32_0 : i32, i32
  }
  func.func @transform_8(%arg0: i32) -> (i32, i32) {
    %c0_i32 = arith.constant 0 : i32
    %c0_i32_0 = arith.constant 0 : i32
    return %arg0, %c0_i32 : i32, i32
  }
}

</mosaic_0001>

<bundles_post_ra>
// kernel: tpu_custom_call.1
= control target key start
LH: loop header
LB: loop body
LE: loop exit
PB: predicated region body
PF: predicated region fallthrough
CT: control target
= control target key end

     0   :  { %13 = vsyncpa [#allocation3], 0  ;;  %s487_s0 = inlined_call_operand.hbm [shape: f32[8,16], index: 0, kind: input, shape index: {}]   ;;  %s488_s1 = inlined_call_operand.hbm [shape: f32[16,128], index: 1, kind: input, shape index: {}]   ;;  %s489_s2 = inlined_call_operand.vmem [shape: f32[1,128], index: 2, kind: input, shape index: {}]   ;;  %s490_s3 = inlined_call_operand.vmem [shape: f32[1,128], index: 3, kind: input, shape index: {}]   ;;  %s491_s4 = inlined_call_operand.hbm [shape: f32[128,128], index: 4, kind: input, shape index: {}]   ;;  %s492_s5 = inlined_call_operand.vmem [shape: f32[1,128], index: 5, kind: input, shape index: {}]   ;;  %s493_s6 = inlined_call_operand.hbm [shape: f32[128,128], index: 6, kind: input, shape index: {}]   ;;  %s494_s7 = inlined_call_operand.vmem [shape: f32[1,128], index: 7, kind: input, shape index: {}]   ;;  %s495_s8 = inlined_call_operand.hbm [shape: f32[8,128], index: 8, kind: output, shape index: {}]  }
   0x1   :  { %14 = vsyncpa [#allocation6], 0 }
   0x2   :  { %15 = vsyncpa [#allocation9], 0  ;;  %s32_s29 = sshll.u32 %s488_s1, 4  ;;  %s33_s29 = int_to_ptr.hbm [resolvable:$true] %s32_s29 }
   0x3   :  { %16 = vsyncpa [#allocation4], 0  ;;  %s403_s30 = smov [#allocation5]   ;;  %s22_s12 = sshll.u32 %s487_s0, 4  ;;  %s23_s12 = int_to_ptr.hbm [resolvable:$true] %s22_s12 }
   0x4   :  { %s34_s9 = sshll.u32 %s403_s30, 4  ;;  %s404_s13 = smov 128   ;;  %s35_s9 = int_to_ptr.vmem [resolvable:$true] %s34_s9 }
   0x5   :  { %s405_s14 = smov 8   ;;  %s406_s15 = smov [#allocation2]  }
   0x6   :  { %40 = dma.hbm_to_vmem [thread:$0]  %s33_s29, 256, %s35_s9, [#allocation6], %s404_s13, %s404_s13, %s405_s14  }
   0x7   :  { %s24_s16 = sshll.u32 %s406_s15, 4  ;;  %s49_s19 = sshll.u32 %s491_s4, 4  ;;  %s25_s16 = int_to_ptr.vmem [resolvable:$true] %s24_s16  ;;  %s50_s19 = int_to_ptr.hbm [resolvable:$true] %s49_s19 }
   0x8   :  { %27 = dma.hbm_to_vmem [thread:$0]  %s23_s12, 128, %s25_s16, [#allocation3]  }
   0x9   :  { %s64_s21 = sshll.u32 %s493_s6, 4  ;;  %s407_s22 = smov [#allocation7]   ;;  %s65_s21 = int_to_ptr.hbm [resolvable:$true] %s64_s21 }
   0xa   :  { %s51_s23 = sshll.u32 %s407_s22, 4  ;;  %s408_s0 = smov [#allocation8]   ;;  %s52_s23 = int_to_ptr.vmem [resolvable:$true] %s51_s23 }
   0xb   :  { %57 = dma.hbm_to_vmem [thread:$0]  %s50_s19, 2048, %s52_s23, [#allocation6], %s404_s13, %s404_s13, %s405_s14  }
   0xc   :  { %s66_s24 = sshll.u32 %s408_s0, 4  ;;  %s67_s24 = int_to_ptr.vmem [resolvable:$true] %s66_s24 }
   0xd   :  { %72 = dma.hbm_to_vmem [thread:$0]  %s65_s21, 2048, %s67_s24, [#allocation9], %s404_s13, %s404_s13, %s405_s14  }
   0xe   :  { %395 = dma.done.wait [#allocation3], 128  }
   0xf   :  { %396 = vsyncadd [#allocation3], 4294967168 }
  0x10   :  { %397 = dma.done.wait [#allocation6], 2304  }
  0x11   :  { %398 = vsyncadd [#allocation6], 4294964992 }
  0x12   :  { %399 = dma.done.wait [#allocation9], 2048  }
  0x13   :  { %400 = vsyncadd [#allocation9], 4294965248  ;;  %v93_v0 = vld [vmem:[#allocation5 + $0x8] sm:$0xff]  ;;  %v92_v1 = vld [vmem:[#allocation5] sm:$0xff]  ;;  %vm98_vm0 = vcmask 130048   ;;  %v122_v3 = vlaneseq  ;;  %s409_s29 = smov [#allocation10]  }
  0x14   :  { %116 = vmatpush.msra.mxu0 %v93_v0  ;;  %v91_v2 = vld [vmem:[#allocation2] sm:$0xff]  ;;  %v173_v14 = vld [vmem:[#allocation7 + $0x78] sm:$0xff]  ;;  %v172_v15 = vld [vmem:[#allocation7 + $0x70] sm:$0xff]  ;;  %s245_s30 = sshll.u32 %s409_s29, 4  ;;  %s247_s11 = sshll.u32 %s495_s8, 4  ;;  %s246_s30 = int_to_ptr.vmem [resolvable:$true] %s245_s30  ;;  %s248_s11 = int_to_ptr.hbm [resolvable:$true] %s247_s11 }
  0x15   :  { %v123_v4 = vand.u32 127, %v122_v3  ;;  %v267_v5 = vld [vmem:[%s489_s2] ss:$0 sm:$0xff]  ;;  %178 = vmatpush.msra.mxu1 %v173_v14  ;;  %v170_v17 = vld [vmem:[#allocation7 + $0x60] sm:$0xff]  ;;  %v169_v18 = vld [vmem:[#allocation7 + $0x58] sm:$0xff] }
  0x16   :  { %117 = vmatpush.msra.mxu0 %v92_v1  ;;  %v171_v16 = vld [vmem:[#allocation7 + $0x68] sm:$0xff]  ;;  %v168_v19 = vld [vmem:[#allocation7 + $0x50] sm:$0xff]  ;;  %v166_v21 = vld [vmem:[#allocation7 + $0x40] sm:$0xff] }
  0x17   :  { %259 = vmatmul.msk.f32.vlgmr.msra.gmra.mxu0 %vm98_vm0, %v91_v2  ;;  %vm124_vm1 = vcmp.lt.s32.totalorder %v123_v4, 32  ;;  %179 = vmatpush.msra.mxu1 %v172_v15  ;;  %v167_v20 = vld [vmem:[#allocation7 + $0x48] sm:$0xff]  ;;  %v165_v22 = vld [vmem:[#allocation7 + $0x38] sm:$0xff]  ;;  %v164_v23 = vld [vmem:[#allocation7 + $0x30] sm:$0xff] }
  0x18   :  { %v163_v24 = vld [vmem:[#allocation7 + $0x28] sm:$0xff]  ;;  %v162_v25 = vld [vmem:[#allocation7 + $0x20] sm:$0xff]  ;;  %v161_v26 = vld [vmem:[#allocation7 + $0x18] sm:$0xff] }
  0x19   :  { %180 = vmatpush.msra.mxu1 %v171_v16  ;;  %v160_v27 = vld [vmem:[#allocation7 + $0x10] sm:$0xff]  ;;  %v159_v30 = vld [vmem:[#allocation7 + $0x8] sm:$0xff]  ;;  %v158_v31 = vld [vmem:[#allocation7] sm:$0xff] }
  0x1a   :  { %v214_v32 = vld [vmem:[#allocation8 + $0x78] sm:$0xff]  ;;  %v213_v33 = vld [vmem:[#allocation8 + $0x70] sm:$0xff]  ;;  %v212_v35 = vld [vmem:[#allocation8 + $0x68] sm:$0xff] }
  0x1b   :  { %181 = vmatpush.msra.mxu1 %v170_v17  ;;  %219 = vmatpush.msra.mxu2 %v214_v32  ;;  %v211_v37 = vld [vmem:[#allocation8 + $0x60] sm:$0xff]  ;;  %v210_v39 = vld [vmem:[#allocation8 + $0x58] sm:$0xff]  ;;  %v209_v41 = vld [vmem:[#allocation8 + $0x50] sm:$0xff] }
  0x1c   :  { %v208_v43 = vld [vmem:[#allocation8 + $0x48] sm:$0xff]  ;;  %v207_v45 = vld [vmem:[#allocation8 + $0x40] sm:$0xff]  ;;  %v206_v48 = vld [vmem:[#allocation8 + $0x38] sm:$0xff] }
  0x1d   :  { %182 = vmatpush.msra.mxu1 %v169_v18  ;;  %220 = vmatpush.msra.mxu2 %v213_v33  ;;  %v205_v51 = vld [vmem:[#allocation8 + $0x30] sm:$0xff]  ;;  %v204_v53 = vld [vmem:[#allocation8 + $0x28] sm:$0xff]  ;;  %v203_v54 = vld [vmem:[#allocation8 + $0x20] sm:$0xff] }
  0x1e   :  { %v202_v55 = vld [vmem:[#allocation8 + $0x18] sm:$0xff]  ;;  %v268_v56 = vld [vmem:[%s490_s3] ss:$0 sm:$0xff]  ;;  %v201_v61 = vld [vmem:[#allocation8 + $0x10] sm:$0xff] }
  0x1f   :  { %183 = vmatpush.msra.mxu1 %v168_v19  ;;  %221 = vmatpush.msra.mxu2 %v212_v35  ;;  %v200_v62 = vld [vmem:[#allocation8 + $0x8] sm:$0xff]  ;;  %v199_v63 = vld [vmem:[#allocation8] sm:$0xff] }
  0x20   :  { %v269_v0 = vld [vmem:[%s492_s5] ss:$0 sm:$0xff] }
  0x21   :  { %184 = vmatpush.msra.mxu1 %v167_v20  ;;  %222 = vmatpush.msra.mxu2 %v211_v37  ;;  %v270_v4 = vld [vmem:[%s494_s7] ss:$0 sm:$0xff] }
  0x23   :  { %185 = vmatpush.msra.mxu1 %v166_v21  ;;  %223 = vmatpush.msra.mxu2 %v210_v39 }
  0x25   :  { %186 = vmatpush.msra.mxu1 %v165_v22  ;;  %224 = vmatpush.msra.mxu2 %v209_v41 }
  0x27   :  { %187 = vmatpush.msra.mxu1 %v164_v23  ;;  %225 = vmatpush.msra.mxu2 %v208_v43 }
  0x29   :  { %188 = vmatpush.msra.mxu1 %v163_v24  ;;  %226 = vmatpush.msra.mxu2 %v207_v45 }
  0x2b   :  { %189 = vmatpush.msra.mxu1 %v162_v25  ;;  %227 = vmatpush.msra.mxu2 %v206_v48 }
  0x2d   :  { %190 = vmatpush.msra.mxu1 %v161_v26  ;;  %228 = vmatpush.msra.mxu2 %v205_v51 }
  0x2f   :  { %191 = vmatpush.msra.mxu1 %v160_v27  ;;  %229 = vmatpush.msra.mxu2 %v204_v53 }
  0x31   :  { %192 = vmatpush.msra.mxu1 %v159_v30  ;;  %230 = vmatpush.msra.mxu2 %v203_v54 }
  0x33   :  { %193 = vmatpush.msra.mxu1 %v158_v31  ;;  %231 = vmatpush.msra.mxu2 %v202_v55 }
  0x35   :  { %232 = vmatpush.msra.mxu2 %v201_v61 }
  0x37   :  { %233 = vmatpush.msra.mxu2 %v200_v62 }
  0x39   :  { %234 = vmatpush.msra.mxu2 %v199_v63 }
  0x94   :  { %v119_v6 = vpop.f32.mrf.mxu0 }
  0x95   :  { %v120_v7 = vadd.f32 %v267_v5, %v119_v6 }
  0x97   :  { %v127_v8 = vsel %vm124_vm1, %v120_v7, 0.0 }
  0x98   :  { %128 = vadd.xlane.f32.xlu0 %v127_v8 }
 0x10b   :  { %v129_v9 = vpop.xlane.xlu0 %128 }
 0x10c   :  { %v130_v10 = vmul.f32 0.03125, %v129_v9 }
 0x10e   :  { %v470_v11 = vsub.f32 %v120_v7, %v130_v10 }
 0x110   :  { %v132_v12 = vmul.f32 %v470_v11, %v470_v11 }
 0x112   :  { %v133_v13 = vsel %vm124_vm1, %v132_v12, 0.0 }
 0x113   :  { %134 = vadd.xlane.f32.xlu0 %v133_v13 }
 0x186   :  { %v135_v28 = vpop.xlane.xlu0 %134 }
 0x187   :  { %v136_v29 = vmul.f32 0.032258064, %v135_v28 }
 0x189   :  { %271 = vrsqrt.f32 %v136_v29  ;;  %vm144_vm2 = vcmp.eq.f32.partialorder %v136_v29, inf  ;;  %v147_v47 = vand.u32 2147483648, %v136_v29  ;;  %vm146_vm3 = vcmp.eq.f32.partialorder %v136_v29, 0.0 }
 0x18f   :  { %v272_v34 = vpop.eup %271 }
 0x190   :  { %v138_v36 = vmul.f32 %v272_v34, %v136_v29 }
 0x192   :  { %v139_v38 = vmul.f32 %v272_v34, %v138_v36 }
 0x194   :  { %v140_v40 = vmul.f32 0.5, %v139_v38 }
 0x196   :  { %v141_v42 = vsub.f32 1.5, %v140_v40 }
 0x198   :  { %v142_v44 = vmul.f32 %v272_v34, %v141_v42 }
 0x19a   :  { %v143_v46 = vmul.f32 %v142_v44, %v136_v29 }
 0x19c   :  { %v145_v49 = vsel %vm144_vm2, %v136_v29, %v143_v46 }
 0x19d   :  { %v148_v50 = vsel %vm146_vm3, %v147_v47, %v145_v49 }
 0x19e   :  { %v149_v52 = vadd.f32 1e-06, %v148_v50 }
 0x1a0   :  { %273 = vrcp.f32 %v149_v52 }
 0x1a6   :  { %v274_v57 = vpop.eup %273 }
 0x1a7   :  { %v151_v58 = vmul.f32 %v274_v57, %v470_v11 }
 0x1a9   :  { %v156_v59 = vadd.f32 %v268_v56, %v151_v58 }
 0x1ab   :  { %v157_v60 = vmax.f32 %v156_v59, 0.0 }
 0x1ad   :  { %194 = vmatmul.f32.vlgmr.msra.gmra.mxu1 %v157_v60 }
 0x22a   :  { %v195_v1 = vpop.f32.mrf.mxu1 }
 0x22b   :  { %v196_v2 = vadd.f32 %v269_v0, %v195_v1 }
 0x22d   :  { %v198_v3 = vmax.f32 %v196_v2, 0.0 }
 0x22f   :  { %235 = vmatmul.f32.vlgmr.msra.gmra.mxu2 %v198_v3 }
 0x2b2   :  { %v236_v5 = vpop.f32.mrf.mxu2 }
 0x2b3   :  { %v237_v6 = vadd.f32 %v270_v4, %v236_v5 }
 0x2b5   :  { %239 = vst [vmem:[#allocation10] sm:$0xff] %v237_v6 }
 0x2b6   :  { %250 = dma.vmem_to_hbm [thread:$0]  %s246_s30, 128, %s248_s11, [#allocation4]  }
 0x2b7   :  { %401 = dma.done.wait [#allocation4], 128  }
 0x2b8   :  { %402 = vsyncadd [#allocation4], 4294967168 }
 0x2b9   :  { %255 = vsyncpa [#allocation3], 1 }
 0x2ba   :  { %256 = vsyncpa [#allocation6], 1 }
 0x2bb   :  { %257 = vsyncpa [#allocation9], 1 }
 0x2bc   :  { %258 = vsyncpa [#allocation4], 1 }

</bundles_post_ra>
